<compile_context>
chip_gen: v6e
topology: v6e:2x2x1
jax: 0.10.0
libtpu: 0.0.40
codegen_flags: <defaults>
</compile_context>

<pallas_src>
import jax
import jax.numpy as jnp
from jax import lax
from jax.experimental import pallas as pl
from jax.experimental.pallas import tpu as pltpu

# Model hyperparameters (match the PyTorch module)
HIDDEN_SIZE = 2
INPUT_SIZE = 6
NUM_CLASSES = 1
NUM_LAYERS = 1
FC1_DIM = 128

GATES = 4 * HIDDEN_SIZE          # 8, gate order [i, f, g, o]
LANES = 128                      # params-slab lane width (one lane tile)

# Row layout of the packed parameter slab (16 rows x 128 lanes, f32).
ROW_WIH = 0                          # rows 0..5   : w_ih^T   (I, 4H)
ROW_WHH = ROW_WIH + INPUT_SIZE       # rows 6..7   : w_hh^T   (H, 4H)
ROW_B = ROW_WHH + HIDDEN_SIZE        # row  8      : b_ih+b_hh (1, 4H)
ROW_FC1W = ROW_B + 1                 # rows 9..10  : fc1_w^T  (H, 128)
ROW_FC1B = ROW_FC1W + HIDDEN_SIZE    # row  11     : fc1_b    (1, 128)
ROW_FC2W = ROW_FC1B + 1              # row  12     : fc2_w    (1, 128)
ROW_FC2B = ROW_FC2W + 1              # row  13     : fc2_b    (1, 1)
ROW_SCALE = ROW_FC2B + 1             # row  14     : gate pre/post scale (1, 4H)
ROW_SHIFT = ROW_SCALE + 1            # row  15     : gate post shift     (1, 4H)
P_ROWS = ROW_SHIFT + 1               # 16 rows == two (8,128) tiles == 8 KiB


def lstm_head_kernel(x_ref, p_ref, out_ref):
    """Whole forward pass, everything resident in VMEM, no MXU use.

    x_ref : (T*BP, I) time-major, batch padded to BP=8 rows per step.
    p_ref : (16, 128) packed parameter slab (layout above).
    out_ref: (BP, 1).
    """
    BP = out_ref.shape[0]
    TBP, I = x_ref.shape
    T = TBP // BP
    H = HIDDEN_SIZE
    G = GATES

    # --- static slab views (each used once / hoisted) -------------------
    w_ih = p_ref[ROW_WIH:ROW_WIH + I, 0:G]            # (I, 4H)
    w_hh = p_ref[ROW_WHH:ROW_WHH + H, 0:G]            # (H, 4H)
    b = p_ref[ROW_B:ROW_B + 1, 0:G]                   # (1, 4H)
    fc1_w = p_ref[ROW_FC1W:ROW_FC1W + H, :]           # (H, 128)
    fc1_b = p_ref[ROW_FC1B:ROW_FC1B + 1, :]           # (1, 128)
    fc2_w = p_ref[ROW_FC2W:ROW_FC2W + 1, :]           # (1, 128)
    fc2_b = p_ref[ROW_FC2B:ROW_FC2B + 1, 0:1]         # (1, 1)
    scale = p_ref[ROW_SCALE:ROW_SCALE + 1, 0:G]       # (1, 4H)
    shift = p_ref[ROW_SHIFT:ROW_SHIFT + 1, 0:G]       # (1, 4H)

    # (2) Hoisted input projection as K=6 VPU broadcast-MACs (no MXU
    # fill/drain at the head of the recurrence); bias folded in exactly once.
    x = x_ref[...]                                     # (T*BP, I) f32
    gx = jnp.broadcast_to(b, (TBP, G))                 # (T*BP, 4H)
    for k in range(I):
        gx = gx + x[:, k:k + 1] * w_ih[k:k + 1, :]

    # (5) Loop-invariant broadcasts hoisted out of the unrolled time loop.
    whh_rows = [jnp.broadcast_to(w_hh[k:k + 1, :], (BP, G)) for k in range(H)]
    scale_b = jnp.broadcast_to(scale, (BP, G))
    shift_b = jnp.broadcast_to(shift, (BP, G))

    h = jnp.zeros((BP, H), jnp.float32)
    c = jnp.zeros((BP, H), jnp.float32)

    # (7) Fully unrolled recurrence: only VPU/EUP/XLU work on the serial path.
    for t in range(T):                                 # T static -> unrolled
        gates = gx[t * BP:(t + 1) * BP, :]             # (8,.)-aligned free view
        for k in range(H):                             # VPU broadcast-MACs
            gates = gates + h[:, k:k + 1] * whh_rows[k]

        # (4) Single EUP pass: tanh over the whole (BP, 4H) vreg; i/f/o lanes
        # were pre-scaled by 0.5 and get the 0.5*(1+.) sigmoid fixup, g lanes
        # pass through as tanh (scale=1, shift=0).
        act = jnp.tanh(gates * scale_b) * scale_b + shift_b   # [si, sf, g, so]

        i_g = act[:, 0 * H:1 * H]                      # lane offset 0: free
        f_g = act[:, 1 * H:2 * H]
        g_g = act[:, 2 * H:3 * H]
        o_g = act[:, 3 * H:4 * H]                      # hides under tanh(c)

        c = f_g * c + i_g * g_g
        h = o_g * jnp.tanh(c)

    # hn.view(-1, hidden_size) with num_layers == 1  ->  (BP, H)
    hr = jnp.maximum(h, 0.0)                           # relu(hn)

    # fc_1: fan_in == H == 2 -> VPU MACs (K=2 is a terrible MXU shape).
    out = jnp.broadcast_to(fc1_b, (BP, FC1_DIM))       # (BP, 128)
    for k in range(H):
        out = out + hr[:, k:k + 1] * fc1_w[k:k + 1, :]
    out = jnp.maximum(out, 0.0)                        # relu

    # (3) fc: (BP,128)x(1,128) VPU multiply + XLU lane reduction, no MXU.
    y = jnp.sum(out * fc2_w, axis=-1, keepdims=True) + fc2_b   # (BP, 1)
    out_ref[...] = y.astype(out_ref.dtype)


def init_params(key):
    """Deterministic parameter init, mirroring nn.LSTM / nn.Linear shapes."""
    ks = jax.random.split(key, 8)
    lstm_bound = 1.0 / jnp.sqrt(HIDDEN_SIZE)
    fc1_bound = 1.0 / jnp.sqrt(HIDDEN_SIZE)   # fan_in of fc_1 is hidden_size
    fc2_bound = 1.0 / jnp.sqrt(FC1_DIM)       # fan_in of fc is 128

    def u(k, shape, bound):
        return jax.random.uniform(k, shape, jnp.float32, -bound, bound)

    return dict(
        w_ih=u(ks[0], (4 * HIDDEN_SIZE, INPUT_SIZE), lstm_bound),   # (4H, I)
        w_hh=u(ks[1], (4 * HIDDEN_SIZE, HIDDEN_SIZE), lstm_bound),  # (4H, H)
        b_ih=u(ks[2], (4 * HIDDEN_SIZE,), lstm_bound),
        b_hh=u(ks[3], (4 * HIDDEN_SIZE,), lstm_bound),
        fc1_w=u(ks[4], (FC1_DIM, HIDDEN_SIZE), fc1_bound),          # (128, H)
        fc1_b=u(ks[5], (FC1_DIM,), fc1_bound),
        fc2_w=u(ks[6], (NUM_CLASSES, FC1_DIM), fc2_bound),          # (1, 128)
        fc2_b=u(ks[7], (NUM_CLASSES,), fc2_bound),
    )


def _pack_params(params):
    """Pack every parameter into one (16, 128) f32 slab (2 sublane tiles)."""
    H = HIDDEN_SIZE
    slab = jnp.zeros((P_ROWS, LANES), jnp.float32)
    slab = slab.at[ROW_WIH:ROW_WIH + INPUT_SIZE, 0:GATES].set(
        params["w_ih"].T.astype(jnp.float32))
    slab = slab.at[ROW_WHH:ROW_WHH + H, 0:GATES].set(
        params["w_hh"].T.astype(jnp.float32))
    slab = slab.at[ROW_B, 0:GATES].set(
        (params["b_ih"] + params["b_hh"]).astype(jnp.float32))
    slab = slab.at[ROW_FC1W:ROW_FC1W + H, :].set(
        params["fc1_w"].T.astype(jnp.float32))
    slab = slab.at[ROW_FC1B, :].set(params["fc1_b"].astype(jnp.float32))
    slab = slab.at[ROW_FC2W, :].set(params["fc2_w"][0].astype(jnp.float32))
    slab = slab.at[ROW_FC2B, 0].set(params["fc2_b"][0].astype(jnp.float32))
    # sigmoid-via-tanh fixup constants, gate order [i, f, g, o]:
    #   i/f/o lanes: act = 0.5 * tanh(0.5 * x) + 0.5 == sigmoid(x)
    #   g   lanes:   act = 1.0 * tanh(1.0 * x) + 0.0 == tanh(x)
    gate_scale = jnp.concatenate([jnp.full((2 * H,), 0.5, jnp.float32),
                                  jnp.ones((H,), jnp.float32),
                                  jnp.full((H,), 0.5, jnp.float32)])
    gate_shift = jnp.concatenate([jnp.full((2 * H,), 0.5, jnp.float32),
                                  jnp.zeros((H,), jnp.float32),
                                  jnp.full((H,), 0.5, jnp.float32)])
    slab = slab.at[ROW_SCALE, 0:GATES].set(gate_scale)
    slab = slab.at[ROW_SHIFT, 0:GATES].set(gate_shift)
    return slab


@jax.jit
def lstm_forward(x, params):
    """x: (B, T, I) batch_first, like the PyTorch module."""
    B, T, _ = x.shape
    BP = ((B + 7) // 8) * 8        # pad batch to a full sublane tile

    # Time-major flatten with the batch padded to BP rows per step, so every
    # per-step slice inside the kernel is an (8,.)-aligned static view.
    x_pad = jnp.zeros((BP, T, INPUT_SIZE), jnp.float32)
    x_pad = x_pad.at[:B].set(x.astype(jnp.float32))
    x_flat = jnp.transpose(x_pad, (1, 0, 2)).reshape(T * BP, INPUT_SIZE)

    slab = _pack_params(params)

    vmem = pl.BlockSpec(memory_space=pltpu.MemorySpace.VMEM)
    out = pl.pallas_call(
        lstm_head_kernel,
        out_shape=jax.ShapeDtypeStruct((BP, NUM_CLASSES), jnp.float32),
        in_specs=[vmem, vmem],
        out_specs=vmem,
    )(x_flat, slab)
    return out[:B]


def lstm_forward_ref(x, params):
    """Pure-JAX reference with identical semantics (for correctness check)."""
    H = HIDDEN_SIZE
    w_ih, w_hh = params["w_ih"], params["w_hh"]
    b = params["b_ih"] + params["b_hh"]

    def step(carry, x_t):
        h, c = carry
        gates = x_t @ w_ih.T + h @ w_hh.T + b
        i_g = jax.nn.sigmoid(gates[:, 0 * H:1 * H])
        f_g = jax.nn.sigmoid(gates[:, 1 * H:2 * H])
        g_g = jnp.tanh(gates[:, 2 * H:3 * H])
        o_g = jax.nn.sigmoid(gates[:, 3 * H:4 * H])
        c_new = f_g * c + i_g * g_g
        h_new = o_g * jnp.tanh(c_new)
        return (h_new, c_new), None

    B = x.shape[0]
    h0 = jnp.zeros((B, H), jnp.float32)
    c0 = jnp.zeros((B, H), jnp.float32)
    (h_n, _), _ = lax.scan(step, (h0, c0), jnp.transpose(x, (1, 0, 2)))
    out = jnp.maximum(h_n, 0.0)
    out = jnp.maximum(out @ params["fc1_w"].T + params["fc1_b"], 0.0)
    return out @ params["fc2_w"].T + params["fc2_b"]


if __name__ == "__main__":
    key = jax.random.PRNGKey(0)
    k_param, k_x = jax.random.split(key)
    params = init_params(k_param)

    batch, seq_len = 2, 8
    x = jax.random.normal(k_x, (batch, seq_len, INPUT_SIZE), jnp.float32)

    out = lstm_forward(x, params)
    out = jax.block_until_ready(out)
    assert out.shape == (batch, NUM_CLASSES), out.shape

    ref = lstm_forward_ref(x, params)
    assert jnp.allclose(out, ref, atol=1e-4, rtol=1e-4), (out, ref)

    print("KERNEL_OK")
</pallas_src>

<mosaic_0001>
module attributes {stable_mosaic.version = 11 : i64} {
  func.func @lstm_head_kernel(%arg0: memref<64x6xf32, #tpu.memory_space<vmem>>, %arg1: memref<16x128xf32, #tpu.memory_space<vmem>>, %arg2: memref<8x1xf32, #tpu.memory_space<vmem>>) attributes {dimension_semantics = [], scalar_prefetch = 0 : i64, scratch_operands = 0 : i64, tpu.core_type = #tpu.core_type<tc>} {
    %c0 = arith.constant 0 : index
    %c0_0 = arith.constant 0 : index
    %0 = vector.load %arg1[%c0, %c0_0] : memref<16x128xf32, #tpu.memory_space<vmem>>, vector<6x8xf32>
    %c6 = arith.constant 6 : index
    %c0_1 = arith.constant 0 : index
    %1 = vector.load %arg1[%c6, %c0_1] : memref<16x128xf32, #tpu.memory_space<vmem>>, vector<2x8xf32>
    %c8 = arith.constant 8 : index
    %c0_2 = arith.constant 0 : index
    %2 = vector.load %arg1[%c8, %c0_2] : memref<16x128xf32, #tpu.memory_space<vmem>>, vector<1x8xf32>
    %c9 = arith.constant 9 : index
    %c0_3 = arith.constant 0 : index
    %3 = vector.load %arg1[%c9, %c0_3] : memref<16x128xf32, #tpu.memory_space<vmem>>, vector<2x128xf32>
    %c11 = arith.constant 11 : index
    %c0_4 = arith.constant 0 : index
    %4 = vector.load %arg1[%c11, %c0_4] : memref<16x128xf32, #tpu.memory_space<vmem>>, vector<1x128xf32>
    %c12 = arith.constant 12 : index
    %c0_5 = arith.constant 0 : index
    %5 = vector.load %arg1[%c12, %c0_5] : memref<16x128xf32, #tpu.memory_space<vmem>>, vector<1x128xf32>
    %c13 = arith.constant 13 : index
    %c0_6 = arith.constant 0 : index
    %6 = vector.load %arg1[%c13, %c0_6] : memref<16x128xf32, #tpu.memory_space<vmem>>, vector<1x1xf32>
    %c14 = arith.constant 14 : index
    %c0_7 = arith.constant 0 : index
    %7 = vector.load %arg1[%c14, %c0_7] : memref<16x128xf32, #tpu.memory_space<vmem>>, vector<1x8xf32>
    %c15 = arith.constant 15 : index
    %c0_8 = arith.constant 0 : index
    %8 = vector.load %arg1[%c15, %c0_8] : memref<16x128xf32, #tpu.memory_space<vmem>>, vector<1x8xf32>
    %c0_9 = arith.constant 0 : index
    %c0_10 = arith.constant 0 : index
    %9 = vector.load %arg0[%c0_9, %c0_10] : memref<64x6xf32, #tpu.memory_space<vmem>>, vector<64x6xf32>
    %10 = vector.shape_cast %2 : vector<1x8xf32> to vector<1x8xf32>
    %11 = vector.broadcast %10 : vector<1x8xf32> to vector<64x8xf32>
    %12 = vector.extract_strided_slice %9 {offsets = [0, 0], sizes = [64, 1], strides = [1, 1]} : vector<64x6xf32> to vector<64x1xf32>
    %13 = vector.extract_strided_slice %0 {offsets = [0, 0], sizes = [1, 8], strides = [1, 1]} : vector<6x8xf32> to vector<1x8xf32>
    %14 = vector.broadcast %12 : vector<64x1xf32> to vector<64x8xf32>
    %15 = vector.broadcast %13 : vector<1x8xf32> to vector<64x8xf32>
    %16 = arith.mulf %14, %15 : vector<64x8xf32>
    %17 = arith.addf %11, %16 : vector<64x8xf32>
    %18 = vector.extract_strided_slice %9 {offsets = [0, 1], sizes = [64, 1], strides = [1, 1]} : vector<64x6xf32> to vector<64x1xf32>
    %19 = vector.extract_strided_slice %0 {offsets = [1, 0], sizes = [1, 8], strides = [1, 1]} : vector<6x8xf32> to vector<1x8xf32>
    %20 = vector.broadcast %18 : vector<64x1xf32> to vector<64x8xf32>
    %21 = vector.broadcast %19 : vector<1x8xf32> to vector<64x8xf32>
    %22 = arith.mulf %20, %21 : vector<64x8xf32>
    %23 = arith.addf %17, %22 : vector<64x8xf32>
    %24 = vector.extract_strided_slice %9 {offsets = [0, 2], sizes = [64, 1], strides = [1, 1]} : vector<64x6xf32> to vector<64x1xf32>
    %25 = vector.extract_strided_slice %0 {offsets = [2, 0], sizes = [1, 8], strides = [1, 1]} : vector<6x8xf32> to vector<1x8xf32>
    %26 = vector.broadcast %24 : vector<64x1xf32> to vector<64x8xf32>
    %27 = vector.broadcast %25 : vector<1x8xf32> to vector<64x8xf32>
    %28 = arith.mulf %26, %27 : vector<64x8xf32>
    %29 = arith.addf %23, %28 : vector<64x8xf32>
    %30 = vector.extract_strided_slice %9 {offsets = [0, 3], sizes = [64, 1], strides = [1, 1]} : vector<64x6xf32> to vector<64x1xf32>
    %31 = vector.extract_strided_slice %0 {offsets = [3, 0], sizes = [1, 8], strides = [1, 1]} : vector<6x8xf32> to vector<1x8xf32>
    %32 = vector.broadcast %30 : vector<64x1xf32> to vector<64x8xf32>
    %33 = vector.broadcast %31 : vector<1x8xf32> to vector<64x8xf32>
    %34 = arith.mulf %32, %33 : vector<64x8xf32>
    %35 = arith.addf %29, %34 : vector<64x8xf32>
    %36 = vector.extract_strided_slice %9 {offsets = [0, 4], sizes = [64, 1], strides = [1, 1]} : vector<64x6xf32> to vector<64x1xf32>
    %37 = vector.extract_strided_slice %0 {offsets = [4, 0], sizes = [1, 8], strides = [1, 1]} : vector<6x8xf32> to vector<1x8xf32>
    %38 = vector.broadcast %36 : vector<64x1xf32> to vector<64x8xf32>
    %39 = vector.broadcast %37 : vector<1x8xf32> to vector<64x8xf32>
    %40 = arith.mulf %38, %39 : vector<64x8xf32>
    %41 = arith.addf %35, %40 : vector<64x8xf32>
    %42 = vector.extract_strided_slice %9 {offsets = [0, 5], sizes = [64, 1], strides = [1, 1]} : vector<64x6xf32> to vector<64x1xf32>
    %43 = vector.extract_strided_slice %0 {offsets = [5, 0], sizes = [1, 8], strides = [1, 1]} : vector<6x8xf32> to vector<1x8xf32>
    %44 = vector.broadcast %42 : vector<64x1xf32> to vector<64x8xf32>
    %45 = vector.broadcast %43 : vector<1x8xf32> to vector<64x8xf32>
    %46 = arith.mulf %44, %45 : vector<64x8xf32>
    %47 = arith.addf %41, %46 : vector<64x8xf32>
    %48 = vector.extract_strided_slice %1 {offsets = [0, 0], sizes = [1, 8], strides = [1, 1]} : vector<2x8xf32> to vector<1x8xf32>
    %49 = vector.shape_cast %48 : vector<1x8xf32> to vector<1x8xf32>
    %50 = vector.broadcast %49 : vector<1x8xf32> to vector<8x8xf32>
    %51 = vector.extract_strided_slice %1 {offsets = [1, 0], sizes = [1, 8], strides = [1, 1]} : vector<2x8xf32> to vector<1x8xf32>
    %52 = vector.shape_cast %51 : vector<1x8xf32> to vector<1x8xf32>
    %53 = vector.broadcast %52 : vector<1x8xf32> to vector<8x8xf32>
    %54 = vector.shape_cast %7 : vector<1x8xf32> to vector<1x8xf32>
    %55 = vector.broadcast %54 : vector<1x8xf32> to vector<8x8xf32>
    %56 = vector.shape_cast %8 : vector<1x8xf32> to vector<1x8xf32>
    %57 = vector.broadcast %56 : vector<1x8xf32> to vector<8x8xf32>
    %cst = arith.constant 0.000000e+00 : f32
    %58 = vector.broadcast %cst : f32 to vector<8x2xf32>
    %cst_11 = arith.constant 0.000000e+00 : f32
    %59 = vector.broadcast %cst_11 : f32 to vector<8x2xf32>
    %60 = vector.extract_strided_slice %47 {offsets = [0, 0], sizes = [8, 8], strides = [1, 1]} : vector<64x8xf32> to vector<8x8xf32>
    %61 = vector.extract_strided_slice %58 {offsets = [0, 0], sizes = [8, 1], strides = [1, 1]} : vector<8x2xf32> to vector<8x1xf32>
    %62 = vector.broadcast %61 : vector<8x1xf32> to vector<8x8xf32>
    %63 = arith.mulf %62, %50 : vector<8x8xf32>
    %64 = arith.addf %60, %63 : vector<8x8xf32>
    %65 = vector.extract_strided_slice %58 {offsets = [0, 1], sizes = [8, 1], strides = [1, 1]} : vector<8x2xf32> to vector<8x1xf32>
    %66 = vector.broadcast %65 : vector<8x1xf32> to vector<8x8xf32>
    %67 = arith.mulf %66, %53 : vector<8x8xf32>
    %68 = arith.addf %64, %67 : vector<8x8xf32>
    %69 = arith.mulf %68, %55 : vector<8x8xf32>
    %70 = math.tanh %69 : vector<8x8xf32>
    %71 = arith.mulf %70, %55 : vector<8x8xf32>
    %72 = arith.addf %71, %57 : vector<8x8xf32>
    %73 = vector.extract_strided_slice %72 {offsets = [0, 0], sizes = [8, 2], strides = [1, 1]} : vector<8x8xf32> to vector<8x2xf32>
    %74 = vector.extract_strided_slice %72 {offsets = [0, 2], sizes = [8, 2], strides = [1, 1]} : vector<8x8xf32> to vector<8x2xf32>
    %75 = vector.extract_strided_slice %72 {offsets = [0, 4], sizes = [8, 2], strides = [1, 1]} : vector<8x8xf32> to vector<8x2xf32>
    %76 = vector.extract_strided_slice %72 {offsets = [0, 6], sizes = [8, 2], strides = [1, 1]} : vector<8x8xf32> to vector<8x2xf32>
    %77 = arith.mulf %74, %59 : vector<8x2xf32>
    %78 = arith.mulf %73, %75 : vector<8x2xf32>
    %79 = arith.addf %77, %78 : vector<8x2xf32>
    %80 = math.tanh %79 : vector<8x2xf32>
    %81 = arith.mulf %76, %80 : vector<8x2xf32>
    %82 = vector.extract_strided_slice %47 {offsets = [8, 0], sizes = [8, 8], strides = [1, 1]} : vector<64x8xf32> to vector<8x8xf32>
    %83 = vector.extract_strided_slice %81 {offsets = [0, 0], sizes = [8, 1], strides = [1, 1]} : vector<8x2xf32> to vector<8x1xf32>
    %84 = vector.broadcast %83 : vector<8x1xf32> to vector<8x8xf32>
    %85 = arith.mulf %84, %50 : vector<8x8xf32>
    %86 = arith.addf %82, %85 : vector<8x8xf32>
    %87 = vector.extract_strided_slice %81 {offsets = [0, 1], sizes = [8, 1], strides = [1, 1]} : vector<8x2xf32> to vector<8x1xf32>
    %88 = vector.broadcast %87 : vector<8x1xf32> to vector<8x8xf32>
    %89 = arith.mulf %88, %53 : vector<8x8xf32>
    %90 = arith.addf %86, %89 : vector<8x8xf32>
    %91 = arith.mulf %90, %55 : vector<8x8xf32>
    %92 = math.tanh %91 : vector<8x8xf32>
    %93 = arith.mulf %92, %55 : vector<8x8xf32>
    %94 = arith.addf %93, %57 : vector<8x8xf32>
    %95 = vector.extract_strided_slice %94 {offsets = [0, 0], sizes = [8, 2], strides = [1, 1]} : vector<8x8xf32> to vector<8x2xf32>
    %96 = vector.extract_strided_slice %94 {offsets = [0, 2], sizes = [8, 2], strides = [1, 1]} : vector<8x8xf32> to vector<8x2xf32>
    %97 = vector.extract_strided_slice %94 {offsets = [0, 4], sizes = [8, 2], strides = [1, 1]} : vector<8x8xf32> to vector<8x2xf32>
    %98 = vector.extract_strided_slice %94 {offsets = [0, 6], sizes = [8, 2], strides = [1, 1]} : vector<8x8xf32> to vector<8x2xf32>
    %99 = arith.mulf %96, %79 : vector<8x2xf32>
    %100 = arith.mulf %95, %97 : vector<8x2xf32>
    %101 = arith.addf %99, %100 : vector<8x2xf32>
    %102 = math.tanh %101 : vector<8x2xf32>
    %103 = arith.mulf %98, %102 : vector<8x2xf32>
    %104 = vector.extract_strided_slice %47 {offsets = [16, 0], sizes = [8, 8], strides = [1, 1]} : vector<64x8xf32> to vector<8x8xf32>
    %105 = vector.extract_strided_slice %103 {offsets = [0, 0], sizes = [8, 1], strides = [1, 1]} : vector<8x2xf32> to vector<8x1xf32>
    %106 = vector.broadcast %105 : vector<8x1xf32> to vector<8x8xf32>
    %107 = arith.mulf %106, %50 : vector<8x8xf32>
    %108 = arith.addf %104, %107 : vector<8x8xf32>
    %109 = vector.extract_strided_slice %103 {offsets = [0, 1], sizes = [8, 1], strides = [1, 1]} : vector<8x2xf32> to vector<8x1xf32>
    %110 = vector.broadcast %109 : vector<8x1xf32> to vector<8x8xf32>
    %111 = arith.mulf %110, %53 : vector<8x8xf32>
    %112 = arith.addf %108, %111 : vector<8x8xf32>
    %113 = arith.mulf %112, %55 : vector<8x8xf32>
    %114 = math.tanh %113 : vector<8x8xf32>
    %115 = arith.mulf %114, %55 : vector<8x8xf32>
    %116 = arith.addf %115, %57 : vector<8x8xf32>
    %117 = vector.extract_strided_slice %116 {offsets = [0, 0], sizes = [8, 2], strides = [1, 1]} : vector<8x8xf32> to vector<8x2xf32>
    %118 = vector.extract_strided_slice %116 {offsets = [0, 2], sizes = [8, 2], strides = [1, 1]} : vector<8x8xf32> to vector<8x2xf32>
    %119 = vector.extract_strided_slice %116 {offsets = [0, 4], sizes = [8, 2], strides = [1, 1]} : vector<8x8xf32> to vector<8x2xf32>
    %120 = vector.extract_strided_slice %116 {offsets = [0, 6], sizes = [8, 2], strides = [1, 1]} : vector<8x8xf32> to vector<8x2xf32>
    %121 = arith.mulf %118, %101 : vector<8x2xf32>
    %122 = arith.mulf %117, %119 : vector<8x2xf32>
    %123 = arith.addf %121, %122 : vector<8x2xf32>
    %124 = math.tanh %123 : vector<8x2xf32>
    %125 = arith.mulf %120, %124 : vector<8x2xf32>
    %126 = vector.extract_strided_slice %47 {offsets = [24, 0], sizes = [8, 8], strides = [1, 1]} : vector<64x8xf32> to vector<8x8xf32>
    %127 = vector.extract_strided_slice %125 {offsets = [0, 0], sizes = [8, 1], strides = [1, 1]} : vector<8x2xf32> to vector<8x1xf32>
    %128 = vector.broadcast %127 : vector<8x1xf32> to vector<8x8xf32>
    %129 = arith.mulf %128, %50 : vector<8x8xf32>
    %130 = arith.addf %126, %129 : vector<8x8xf32>
    %131 = vector.extract_strided_slice %125 {offsets = [0, 1], sizes = [8, 1], strides = [1, 1]} : vector<8x2xf32> to vector<8x1xf32>
    %132 = vector.broadcast %131 : vector<8x1xf32> to vector<8x8xf32>
    %133 = arith.mulf %132, %53 : vector<8x8xf32>
    %134 = arith.addf %130, %133 : vector<8x8xf32>
    %135 = arith.mulf %134, %55 : vector<8x8xf32>
    %136 = math.tanh %135 : vector<8x8xf32>
    %137 = arith.mulf %136, %55 : vector<8x8xf32>
    %138 = arith.addf %137, %57 : vector<8x8xf32>
    %139 = vector.extract_strided_slice %138 {offsets = [0, 0], sizes = [8, 2], strides = [1, 1]} : vector<8x8xf32> to vector<8x2xf32>
    %140 = vector.extract_strided_slice %138 {offsets = [0, 2], sizes = [8, 2], strides = [1, 1]} : vector<8x8xf32> to vector<8x2xf32>
    %141 = vector.extract_strided_slice %138 {offsets = [0, 4], sizes = [8, 2], strides = [1, 1]} : vector<8x8xf32> to vector<8x2xf32>
    %142 = vector.extract_strided_slice %138 {offsets = [0, 6], sizes = [8, 2], strides = [1, 1]} : vector<8x8xf32> to vector<8x2xf32>
    %143 = arith.mulf %140, %123 : vector<8x2xf32>
    %144 = arith.mulf %139, %141 : vector<8x2xf32>
    %145 = arith.addf %143, %144 : vector<8x2xf32>
    %146 = math.tanh %145 : vector<8x2xf32>
    %147 = arith.mulf %142, %146 : vector<8x2xf32>
    %148 = vector.extract_strided_slice %47 {offsets = [32, 0], sizes = [8, 8], strides = [1, 1]} : vector<64x8xf32> to vector<8x8xf32>
    %149 = vector.extract_strided_slice %147 {offsets = [0, 0], sizes = [8, 1], strides = [1, 1]} : vector<8x2xf32> to vector<8x1xf32>
    %150 = vector.broadcast %149 : vector<8x1xf32> to vector<8x8xf32>
    %151 = arith.mulf %150, %50 : vector<8x8xf32>
    %152 = arith.addf %148, %151 : vector<8x8xf32>
    %153 = vector.extract_strided_slice %147 {offsets = [0, 1], sizes = [8, 1], strides = [1, 1]} : vector<8x2xf32> to vector<8x1xf32>
    %154 = vector.broadcast %153 : vector<8x1xf32> to vector<8x8xf32>
    %155 = arith.mulf %154, %53 : vector<8x8xf32>
    %156 = arith.addf %152, %155 : vector<8x8xf32>
    %157 = arith.mulf %156, %55 : vector<8x8xf32>
    %158 = math.tanh %157 : vector<8x8xf32>
    %159 = arith.mulf %158, %55 : vector<8x8xf32>
    %160 = arith.addf %159, %57 : vector<8x8xf32>
    %161 = vector.extract_strided_slice %160 {offsets = [0, 0], sizes = [8, 2], strides = [1, 1]} : vector<8x8xf32> to vector<8x2xf32>
    %162 = vector.extract_strided_slice %160 {offsets = [0, 2], sizes = [8, 2], strides = [1, 1]} : vector<8x8xf32> to vector<8x2xf32>
    %163 = vector.extract_strided_slice %160 {offsets = [0, 4], sizes = [8, 2], strides = [1, 1]} : vector<8x8xf32> to vector<8x2xf32>
    %164 = vector.extract_strided_slice %160 {offsets = [0, 6], sizes = [8, 2], strides = [1, 1]} : vector<8x8xf32> to vector<8x2xf32>
    %165 = arith.mulf %162, %145 : vector<8x2xf32>
    %166 = arith.mulf %161, %163 : vector<8x2xf32>
    %167 = arith.addf %165, %166 : vector<8x2xf32>
    %168 = math.tanh %167 : vector<8x2xf32>
    %169 = arith.mulf %164, %168 : vector<8x2xf32>
    %170 = vector.extract_strided_slice %47 {offsets = [40, 0], sizes = [8, 8], strides = [1, 1]} : vector<64x8xf32> to vector<8x8xf32>
    %171 = vector.extract_strided_slice %169 {offsets = [0, 0], sizes = [8, 1], strides = [1, 1]} : vector<8x2xf32> to vector<8x1xf32>
    %172 = vector.broadcast %171 : vector<8x1xf32> to vector<8x8xf32>
    %173 = arith.mulf %172, %50 : vector<8x8xf32>
    %174 = arith.addf %170, %173 : vector<8x8xf32>
    %175 = vector.extract_strided_slice %169 {offsets = [0, 1], sizes = [8, 1], strides = [1, 1]} : vector<8x2xf32> to vector<8x1xf32>
    %176 = vector.broadcast %175 : vector<8x1xf32> to vector<8x8xf32>
    %177 = arith.mulf %176, %53 : vector<8x8xf32>
    %178 = arith.addf %174, %177 : vector<8x8xf32>
    %179 = arith.mulf %178, %55 : vector<8x8xf32>
    %180 = math.tanh %179 : vector<8x8xf32>
    %181 = arith.mulf %180, %55 : vector<8x8xf32>
    %182 = arith.addf %181, %57 : vector<8x8xf32>
    %183 = vector.extract_strided_slice %182 {offsets = [0, 0], sizes = [8, 2], strides = [1, 1]} : vector<8x8xf32> to vector<8x2xf32>
    %184 = vector.extract_strided_slice %182 {offsets = [0, 2], sizes = [8, 2], strides = [1, 1]} : vector<8x8xf32> to vector<8x2xf32>
    %185 = vector.extract_strided_slice %182 {offsets = [0, 4], sizes = [8, 2], strides = [1, 1]} : vector<8x8xf32> to vector<8x2xf32>
    %186 = vector.extract_strided_slice %182 {offsets = [0, 6], sizes = [8, 2], strides = [1, 1]} : vector<8x8xf32> to vector<8x2xf32>
    %187 = arith.mulf %184, %167 : vector<8x2xf32>
    %188 = arith.mulf %183, %185 : vector<8x2xf32>
    %189 = arith.addf %187, %188 : vector<8x2xf32>
    %190 = math.tanh %189 : vector<8x2xf32>
    %191 = arith.mulf %186, %190 : vector<8x2xf32>
    %192 = vector.extract_strided_slice %47 {offsets = [48, 0], sizes = [8, 8], strides = [1, 1]} : vector<64x8xf32> to vector<8x8xf32>
    %193 = vector.extract_strided_slice %191 {offsets = [0, 0], sizes = [8, 1], strides = [1, 1]} : vector<8x2xf32> to vector<8x1xf32>
    %194 = vector.broadcast %193 : vector<8x1xf32> to vector<8x8xf32>
    %195 = arith.mulf %194, %50 : vector<8x8xf32>
    %196 = arith.addf %192, %195 : vector<8x8xf32>
    %197 = vector.extract_strided_slice %191 {offsets = [0, 1], sizes = [8, 1], strides = [1, 1]} : vector<8x2xf32> to vector<8x1xf32>
    %198 = vector.broadcast %197 : vector<8x1xf32> to vector<8x8xf32>
    %199 = arith.mulf %198, %53 : vector<8x8xf32>
    %200 = arith.addf %196, %199 : vector<8x8xf32>
    %201 = arith.mulf %200, %55 : vector<8x8xf32>
    %202 = math.tanh %201 : vector<8x8xf32>
    %203 = arith.mulf %202, %55 : vector<8x8xf32>
    %204 = arith.addf %203, %57 : vector<8x8xf32>
    %205 = vector.extract_strided_slice %204 {offsets = [0, 0], sizes = [8, 2], strides = [1, 1]} : vector<8x8xf32> to vector<8x2xf32>
    %206 = vector.extract_strided_slice %204 {offsets = [0, 2], sizes = [8, 2], strides = [1, 1]} : vector<8x8xf32> to vector<8x2xf32>
    %207 = vector.extract_strided_slice %204 {offsets = [0, 4], sizes = [8, 2], strides = [1, 1]} : vector<8x8xf32> to vector<8x2xf32>
    %208 = vector.extract_strided_slice %204 {offsets = [0, 6], sizes = [8, 2], strides = [1, 1]} : vector<8x8xf32> to vector<8x2xf32>
    %209 = arith.mulf %206, %189 : vector<8x2xf32>
    %210 = arith.mulf %205, %207 : vector<8x2xf32>
    %211 = arith.addf %209, %210 : vector<8x2xf32>
    %212 = math.tanh %211 : vector<8x2xf32>
    %213 = arith.mulf %208, %212 : vector<8x2xf32>
    %214 = vector.extract_strided_slice %47 {offsets = [56, 0], sizes = [8, 8], strides = [1, 1]} : vector<64x8xf32> to vector<8x8xf32>
    %215 = vector.extract_strided_slice %213 {offsets = [0, 0], sizes = [8, 1], strides = [1, 1]} : vector<8x2xf32> to vector<8x1xf32>
    %216 = vector.broadcast %215 : vector<8x1xf32> to vector<8x8xf32>
    %217 = arith.mulf %216, %50 : vector<8x8xf32>
    %218 = arith.addf %214, %217 : vector<8x8xf32>
    %219 = vector.extract_strided_slice %213 {offsets = [0, 1], sizes = [8, 1], strides = [1, 1]} : vector<8x2xf32> to vector<8x1xf32>
    %220 = vector.broadcast %219 : vector<8x1xf32> to vector<8x8xf32>
    %221 = arith.mulf %220, %53 : vector<8x8xf32>
    %222 = arith.addf %218, %221 : vector<8x8xf32>
    %223 = arith.mulf %222, %55 : vector<8x8xf32>
    %224 = math.tanh %223 : vector<8x8xf32>
    %225 = arith.mulf %224, %55 : vector<8x8xf32>
    %226 = arith.addf %225, %57 : vector<8x8xf32>
    %227 = vector.extract_strided_slice %226 {offsets = [0, 0], sizes = [8, 2], strides = [1, 1]} : vector<8x8xf32> to vector<8x2xf32>
    %228 = vector.extract_strided_slice %226 {offsets = [0, 2], sizes = [8, 2], strides = [1, 1]} : vector<8x8xf32> to vector<8x2xf32>
    %229 = vector.extract_strided_slice %226 {offsets = [0, 4], sizes = [8, 2], strides = [1, 1]} : vector<8x8xf32> to vector<8x2xf32>
    %230 = vector.extract_strided_slice %226 {offsets = [0, 6], sizes = [8, 2], strides = [1, 1]} : vector<8x8xf32> to vector<8x2xf32>
    %231 = arith.mulf %228, %211 : vector<8x2xf32>
    %232 = arith.mulf %227, %229 : vector<8x2xf32>
    %233 = arith.addf %231, %232 : vector<8x2xf32>
    %234 = math.tanh %233 : vector<8x2xf32>
    %235 = arith.mulf %230, %234 : vector<8x2xf32>
    %cst_12 = arith.constant 0.000000e+00 : f32
    %236 = vector.broadcast %cst_12 : f32 to vector<8x2xf32>
    %237 = arith.maximumf %235, %236 : vector<8x2xf32>
    %238 = vector.shape_cast %4 : vector<1x128xf32> to vector<1x128xf32>
    %239 = vector.broadcast %238 : vector<1x128xf32> to vector<8x128xf32>
    %240 = vector.extract_strided_slice %237 {offsets = [0, 0], sizes = [8, 1], strides = [1, 1]} : vector<8x2xf32> to vector<8x1xf32>
    %241 = vector.extract_strided_slice %3 {offsets = [0, 0], sizes = [1, 128], strides = [1, 1]} : vector<2x128xf32> to vector<1x128xf32>
    %242 = vector.broadcast %240 : vector<8x1xf32> to vector<8x128xf32>
    %243 = vector.broadcast %241 : vector<1x128xf32> to vector<8x128xf32>
    %244 = arith.mulf %242, %243 : vector<8x128xf32>
    %245 = arith.addf %239, %244 : vector<8x128xf32>
    %246 = vector.extract_strided_slice %237 {offsets = [0, 1], sizes = [8, 1], strides = [1, 1]} : vector<8x2xf32> to vector<8x1xf32>
    %247 = vector.extract_strided_slice %3 {offsets = [1, 0], sizes = [1, 128], strides = [1, 1]} : vector<2x128xf32> to vector<1x128xf32>
    %248 = vector.broadcast %246 : vector<8x1xf32> to vector<8x128xf32>
    %249 = vector.broadcast %247 : vector<1x128xf32> to vector<8x128xf32>
    %250 = arith.mulf %248, %249 : vector<8x128xf32>
    %251 = arith.addf %245, %250 : vector<8x128xf32>
    %cst_13 = arith.constant 0.000000e+00 : f32
    %252 = vector.broadcast %cst_13 : f32 to vector<8x128xf32>
    %253 = arith.maximumf %251, %252 : vector<8x128xf32>
    %254 = vector.broadcast %5 : vector<1x128xf32> to vector<8x128xf32>
    %255 = arith.mulf %253, %254 : vector<8x128xf32>
    %cst_14 = arith.constant dense<0.000000e+00> : vector<8xf32>
    %256 = vector.multi_reduction <add>, %255, %cst_14 [1] : vector<8x128xf32> to vector<8xf32>
    %257 = vector.shape_cast %256 : vector<8xf32> to vector<8x1xf32>
    %258 = vector.broadcast %6 : vector<1x1xf32> to vector<8x1xf32>
    %259 = arith.addf %257, %258 : vector<8x1xf32>
    %c0_15 = arith.constant 0 : index
    %c0_16 = arith.constant 0 : index
    %260 = vector.load %arg2[%c0_15, %c0_16] : memref<8x1xf32, #tpu.memory_space<vmem>>, vector<8x1xf32>
    tpu.vector_store %arg2[%c0_15, %c0_16], %259 {strides = array<i32>} : memref<8x1xf32, #tpu.memory_space<vmem>>, vector<8x1xf32>,
    return
  }
}

</mosaic_0001>

<bundles_post_ra>
// kernel: lstm_forward.1
= control target key start
LH: loop header
LB: loop body
LE: loop exit
PB: predicated region body
PF: predicated region fallthrough
CT: control target
= control target key end

     0   :  { %v787_v0 = vmov 0   ;;  %v788_v1 = vmov 2   ;;  %v789_v3 = vmov 1   ;;  %v790_v4 = vmov 3   ;;  %s793_s21 = smov 124   ;;  %s794_s22 = smov 2   ;;  %s1081_s0 = inlined_call_operand.vmem [shape: f32[64,6], index: 0, kind: input, shape index: {}]   ;;  %s1082_s1 = inlined_call_operand.vmem [shape: f32[16,128], index: 1, kind: input, shape index: {}]   ;;  %s1083_s2 = inlined_call_operand.vmem [shape: f32[8,1], index: 2, kind: output, shape index: {}]  }
   0x1   :  { %693 = vset.pattern.permute.xlu0 %v787_v0  ;;  %695 = vset.pattern.permute.xlu1 %v788_v1  ;;  %v20_v2 = vld [vmem:[%s1081_s0] sm:$0xff]  ;;  %v791_v5 = vmov 4   ;;  %v792_v6 = vmov 5   ;;  %v72_v7 = vlaneseq  ;;  %v841_v19 = vld [vmem:[%s1082_s1 + $0x8] ss:$0 sm:$0xff]  ;;  %v795_v60 = vmov 6  }
   0x2   :  { %34 = vperm.xlu0 %693, %v20_v2   ;;  %145 = vperm.xlu1 %695, %v20_v2   ;;  %v11_v10 = vld [vmem:[%s1082_s1] sm:$0x3f]  ;;  %v12_v29 = vld [vmem:[%s1082_s1 + $0x6] sm:$0x3]  ;;  %v871_v47 = vld [vmem:[%s1082_s1 + $0xe] ss:$0 sm:$0xff] }
   0x3   :  { %v73_v8 = vshrl.u32 %v72_v7, 7  ;;  %v877_v51 = vld [vmem:[%s1082_s1 + $0xf] ss:$0 sm:$0xff]  ;;  %s796_s25 = smov 4   ;;  %v797_v62 = vmov 7   ;;  %vm670_vm0 = vcmask 7168  }
   0x4   :  { %v21_v56 = vld [vmem:[%s1081_s0 + $0x8] sm:$0xff] }
   0x5   :  { %v824_v9 = vsub.s32 0, %v73_v8  ;;  %v832_v12 = vsub.s32 1, %v73_v8  ;;  %v178_v14 = vsub.s32 2, %v73_v8  ;;  %v230_v18 = vsub.s32 3, %v73_v8 }
   0x6   :  { %694 = vset.pattern.permute.xlu0 %v789_v3  ;;  %696 = vset.pattern.permute.xlu1 %v790_v4  ;;  %v282_v20 = vsub.s32 4, %v73_v8  ;;  %v334_v22 = vsub.s32 5, %v73_v8 }
   0x7   :  { %93 = vperm.xlu0 %694, %v20_v2   ;;  %197 = vperm.xlu1 %696, %v20_v2   ;;  %v830_v11 = vrot.slane %v11_v10, %v824_v9  ;;  %v836_v17 = vrot.slane %v11_v10, %v832_v12  ;;  %v843_v21 = vrot.slane %v11_v10, %v178_v14 }
   0x8   :  { %v847_v27 = vrot.slane %v11_v10, %v230_v18  ;;  %v849_v28 = vrot.slane %v11_v10, %v282_v20  ;;  %v855_v32 = vrot.slane %v11_v10, %v334_v22  ;;  %v859_v36 = vrot.slane %v12_v29, %v824_v9 }
   0x9   :  { %v863_v40 = vrot.slane %v12_v29, %v832_v12 }
   0xa   :  { %v368_v43 = vmul.f32 0.0, %v859_v36 }
   0xb   :  { %697 = vset.pattern.permute.xlu1 %v791_v5  ;;  %698 = vset.pattern.permute.xlu0 %v792_v6  ;;  %v370_v44 = vmul.f32 0.0, %v863_v40 }
   0xc   :  { %249 = vperm.xlu1 %697, %v20_v2   ;;  %301 = vperm.xlu0 %698, %v20_v2  }
  0x10   :  { %699 = vset.pattern.permute.xlu1 %v787_v0  ;;  %700 = vset.pattern.permute.xlu0 %v789_v3 }
  0x7d   :  { %v35_v13 = vpop.permute.xlu0 %34  ;;  %v146_v15 = vpop.permute.xlu1 %145 }
  0x7e   :  { %v76_v16 = vmul.f32 %v830_v11, %v35_v13  ;;  %v180_v30 = vmul.f32 %v843_v21, %v146_v15 }
  0x80   :  { %v84_v25 = vadd.f32 %v841_v19, %v76_v16 }
  0x82   :  { %v94_v23 = vpop.permute.xlu0 %93  ;;  %v198_v24 = vpop.permute.xlu1 %197 }
  0x83   :  { %v128_v26 = vmul.f32 %v836_v17, %v94_v23  ;;  %v232_v34 = vmul.f32 %v847_v27, %v198_v24 }
  0x85   :  { %v136_v31 = vadd.f32 %v128_v26, %v84_v25 }
  0x87   :  { %v188_v33 = vadd.f32 %v180_v30, %v136_v31  ;;  %v250_v35 = vpop.permute.xlu1 %249  ;;  %v302_v37 = vpop.permute.xlu0 %301 }
  0x88   :  { %v284_v38 = vmul.f32 %v849_v28, %v250_v35  ;;  %v336_v41 = vmul.f32 %v855_v32, %v302_v37 }
  0x89   :  { %v240_v39 = vadd.f32 %v232_v34, %v188_v33 }
  0x8b   :  { %v292_v42 = vadd.f32 %v284_v38, %v240_v39 }
  0x8d   :  { %v344_v45 = vadd.f32 %v336_v41, %v292_v42 }
  0x8f   :  { %v369_v46 = vadd.f32 %v368_v43, %v344_v45 }
  0x91   :  { %v371_v48 = vadd.f32 %v370_v44, %v369_v46 }
  0x93   :  { %v372_v49 = vmul.f32 %v871_v47, %v371_v48 }
  0x95   :  { %755 = vtanh.f32 %v372_v49  ;;  %v22_v49 = vld [vmem:[%s1081_s0 + $0x10] sm:$0xff] }
  0xa2   :  { %v756_v50 = vpop.eup %755 }
  0xa3   :  { %v374_v52 = vmul.f32 %v756_v50, %v871_v47 }
  0xa5   :  { %v375_v53 = vadd.f32 %v877_v51, %v374_v52 }
  0xa7   :  { %378 = vrot.lane.b32.xlu1 %v375_v53, %s793_s21  ;;  %v376_v57 = vmul.f32 0.0, %v375_v53 }
 0x119   :  { %v379_v54 = vpop.permute.xlu1 %378 }
 0x11a   :  { %v381_v55 = vmul.f32 %v379_v54, %v375_v53 }
 0x11c   :  { %383 = vrot.lane.b32.xlu1 %v381_v55, %s794_s22 }
 0x120   :  { %39 = vperm.xlu1 %699, %v21_v56  }
 0x124   :  { %701 = vset.pattern.permute.xlu1 %v788_v1 }
 0x125   :  { %149 = vperm.xlu1 %701, %v21_v56  }
 0x129   :  { %702 = vset.pattern.permute.xlu1 %v790_v4 }
 0x12a   :  { %201 = vperm.xlu1 %702, %v21_v56  }
 0x12e   :  { %704 = vset.pattern.permute.xlu1 %v792_v6 }
 0x12f   :  { %305 = vperm.xlu1 %704, %v21_v56  }
 0x133   :  { %705 = vset.pattern.permute.xlu1 %v795_v60 }
 0x18e   :  { %v384_v58 = vpop.permute.xlu1 %383 }
 0x18f   :  { %v386_v59 = vadd.f32 %v384_v58, %v376_v57 }
 0x191   :  { %757 = vtanh.f32 %v386_v59 }
 0x19b   :  { %v40_v7 = vpop.permute.xlu1 %39 }
 0x19c   :  { %v77_v8 = vmul.f32 %v830_v11, %v40_v7 }
 0x19e   :  { %v758_v61 = vpop.eup %757  ;;  %v85_v14 = vadd.f32 %v841_v19, %v77_v8 }
 0x19f   :  { %389 = vrot.lane.b32.xlu0 %v758_v61, %s796_s25 }
 0x1a0   :  { %v150_v13 = vpop.permute.xlu1 %149 }
 0x1a1   :  { %v181_v16 = vmul.f32 %v843_v21, %v150_v13 }
 0x1a3   :  { %97 = vperm.xlu0 %700, %v21_v56  }
 0x1a5   :  { %v202_v20 = vpop.permute.xlu1 %201 }
 0x1a6   :  { %v233_v23 = vmul.f32 %v847_v27, %v202_v20 }
 0x1a7   :  { %703 = vset.pattern.permute.xlu0 %v791_v5 }
 0x1a8   :  { %253 = vperm.xlu0 %703, %v21_v56  }
 0x1aa   :  { %v306_v29 = vpop.permute.xlu1 %305 }
 0x1ab   :  { %v337_v31 = vmul.f32 %v855_v32, %v306_v29 }
 0x1ac   :  { %706 = vset.pattern.permute.xlu0 %v797_v62 }
 0x211   :  { %v390_v63 = vpop.permute.xlu0 %389 }
 0x212   :  { %v392_v2 = vmul.f32 %v390_v63, %v375_v53 }
 0x214   :  { %401 = vperm.xlu0 %706, %v392_v2   ;;  %395 = vperm.xlu1 %705, %v392_v2  }
 0x218   :  { %707 = vset.pattern.permute.xlu1 %v787_v0  ;;  %708 = vset.pattern.permute.xlu0 %v789_v3 }
 0x21e   :  { %v98_v10 = vpop.permute.xlu0 %97 }
 0x21f   :  { %v129_v15 = vmul.f32 %v836_v17, %v98_v10 }
 0x221   :  { %v137_v18 = vadd.f32 %v129_v15, %v85_v14 }
 0x223   :  { %v189_v22 = vadd.f32 %v181_v16, %v137_v18  ;;  %v254_v24 = vpop.permute.xlu0 %253 }
 0x224   :  { %v285_v26 = vmul.f32 %v849_v28, %v254_v24 }
 0x225   :  { %v241_v25 = vadd.f32 %v233_v23, %v189_v22 }
 0x227   :  { %v293_v30 = vadd.f32 %v285_v26, %v241_v25 }
 0x229   :  { %v345_v35 = vadd.f32 %v337_v31, %v293_v30 }
 0x28f   :  { %v396_v33 = vpop.permute.xlu1 %395  ;;  %v402_v34 = vpop.permute.xlu0 %401 }
 0x290   :  { %v398_v37 = vmul.f32 %v396_v33, %v859_v36  ;;  %v404_v39 = vmul.f32 %v402_v34, %v863_v40 }
 0x292   :  { %v399_v38 = vadd.f32 %v398_v37, %v345_v35 }
 0x294   :  { %v405_v41 = vadd.f32 %v404_v39, %v399_v38 }
 0x296   :  { %v406_v42 = vmul.f32 %v871_v47, %v405_v41 }
 0x298   :  { %759 = vtanh.f32 %v406_v42  ;;  %v23_v42 = vld [vmem:[%s1081_s0 + $0x18] sm:$0xff] }
 0x2a5   :  { %v760_v43 = vpop.eup %759 }
 0x2a6   :  { %v408_v44 = vmul.f32 %v760_v43, %v871_v47 }
 0x2a8   :  { %v409_v45 = vadd.f32 %v877_v51, %v408_v44 }
 0x2aa   :  { %412 = vrot.lane.b32.xlu1 %v409_v45, %s793_s21  ;;  %v410_v50 = vmul.f32 %v409_v45, %v386_v59 }
 0x31c   :  { %v413_v46 = vpop.permute.xlu1 %412 }
 0x31d   :  { %v415_v48 = vmul.f32 %v413_v46, %v409_v45 }
 0x31f   :  { %417 = vrot.lane.b32.xlu1 %v415_v48, %s794_s22 }
 0x323   :  { %44 = vperm.xlu1 %707, %v22_v49  }
 0x327   :  { %709 = vset.pattern.permute.xlu1 %v788_v1 }
 0x328   :  { %153 = vperm.xlu1 %709, %v22_v49  }
 0x32c   :  { %710 = vset.pattern.permute.xlu1 %v790_v4 }
 0x32d   :  { %205 = vperm.xlu1 %710, %v22_v49  }
 0x331   :  { %712 = vset.pattern.permute.xlu1 %v792_v6 }
 0x332   :  { %309 = vperm.xlu1 %712, %v22_v49  }
 0x336   :  { %713 = vset.pattern.permute.xlu1 %v795_v60 }
 0x391   :  { %v418_v52 = vpop.permute.xlu1 %417 }
 0x392   :  { %v420_v53 = vadd.f32 %v418_v52, %v410_v50 }
 0x394   :  { %761 = vtanh.f32 %v420_v53 }
 0x39e   :  { %v45_v57 = vpop.permute.xlu1 %44 }
 0x39f   :  { %v78_v58 = vmul.f32 %v830_v11, %v45_v57 }
 0x3a1   :  { %v762_v54 = vpop.eup %761  ;;  %v86_v63 = vadd.f32 %v841_v19, %v78_v58 }
 0x3a2   :  { %423 = vrot.lane.b32.xlu0 %v762_v54, %s796_s25 }
 0x3a3   :  { %v154_v61 = vpop.permute.xlu1 %153 }
 0x3a4   :  { %v182_v7 = vmul.f32 %v843_v21, %v154_v61 }
 0x3a6   :  { %101 = vperm.xlu0 %708, %v22_v49  }
 0x3a8   :  { %v206_v10 = vpop.permute.xlu1 %205 }
 0x3a9   :  { %v234_v14 = vmul.f32 %v847_v27, %v206_v10 }
 0x3aa   :  { %711 = vset.pattern.permute.xlu0 %v791_v5 }
 0x3ab   :  { %257 = vperm.xlu0 %711, %v22_v49  }
 0x3ad   :  { %v310_v20 = vpop.permute.xlu1 %309 }
 0x3ae   :  { %v338_v23 = vmul.f32 %v855_v32, %v310_v20 }
 0x3af   :  { %714 = vset.pattern.permute.xlu0 %v797_v62 }
 0x414   :  { %v424_v55 = vpop.permute.xlu0 %423 }
 0x415   :  { %v426_v56 = vmul.f32 %v424_v55, %v409_v45 }
 0x417   :  { %435 = vperm.xlu0 %714, %v426_v56   ;;  %429 = vperm.xlu1 %713, %v426_v56  }
 0x41b   :  { %715 = vset.pattern.permute.xlu1 %v787_v0  ;;  %716 = vset.pattern.permute.xlu0 %v789_v3 }
 0x421   :  { %v102_v59 = vpop.permute.xlu0 %101 }
 0x422   :  { %v130_v2 = vmul.f32 %v836_v17, %v102_v59 }
 0x424   :  { %v138_v8 = vadd.f32 %v130_v2, %v86_v63 }
 0x426   :  { %v190_v13 = vadd.f32 %v182_v7, %v138_v8  ;;  %v258_v15 = vpop.permute.xlu0 %257 }
 0x427   :  { %v286_v18 = vmul.f32 %v849_v28, %v258_v15 }
 0x428   :  { %v242_v16 = vadd.f32 %v234_v14, %v190_v13 }
 0x42a   :  { %v294_v22 = vadd.f32 %v286_v18, %v242_v16 }
 0x42c   :  { %v346_v26 = vadd.f32 %v338_v23, %v294_v22 }
 0x492   :  { %v430_v24 = vpop.permute.xlu1 %429  ;;  %v436_v25 = vpop.permute.xlu0 %435 }
 0x493   :  { %v432_v29 = vmul.f32 %v430_v24, %v859_v36  ;;  %v438_v31 = vmul.f32 %v436_v25, %v863_v40 }
 0x495   :  { %v433_v30 = vadd.f32 %v432_v29, %v346_v26 }
 0x497   :  { %v439_v33 = vadd.f32 %v438_v31, %v433_v30 }
 0x499   :  { %v440_v34 = vmul.f32 %v871_v47, %v439_v33 }
 0x49b   :  { %763 = vtanh.f32 %v440_v34  ;;  %v24_v34 = vld [vmem:[%s1081_s0 + $0x20] sm:$0xff] }
 0x4a8   :  { %v764_v35 = vpop.eup %763 }
 0x4a9   :  { %v442_v37 = vmul.f32 %v764_v35, %v871_v47 }
 0x4ab   :  { %v443_v38 = vadd.f32 %v877_v51, %v442_v37 }
 0x4ad   :  { %446 = vrot.lane.b32.xlu1 %v443_v38, %s793_s21  ;;  %v444_v43 = vmul.f32 %v443_v38, %v420_v53 }
 0x51f   :  { %v447_v39 = vpop.permute.xlu1 %446 }
 0x520   :  { %v449_v41 = vmul.f32 %v447_v39, %v443_v38 }
 0x522   :  { %451 = vrot.lane.b32.xlu1 %v449_v41, %s794_s22 }
 0x526   :  { %49 = vperm.xlu1 %715, %v23_v42  }
 0x52a   :  { %717 = vset.pattern.permute.xlu1 %v788_v1 }
 0x52b   :  { %157 = vperm.xlu1 %717, %v23_v42  }
 0x52f   :  { %718 = vset.pattern.permute.xlu1 %v790_v4 }
 0x530   :  { %209 = vperm.xlu1 %718, %v23_v42  }
 0x534   :  { %720 = vset.pattern.permute.xlu1 %v792_v6 }
 0x535   :  { %313 = vperm.xlu1 %720, %v23_v42  }
 0x539   :  { %721 = vset.pattern.permute.xlu1 %v795_v60 }
 0x594   :  { %v452_v44 = vpop.permute.xlu1 %451 }
 0x595   :  { %v454_v45 = vadd.f32 %v452_v44, %v444_v43 }
 0x597   :  { %765 = vtanh.f32 %v454_v45 }
 0x5a1   :  { %v50_v50 = vpop.permute.xlu1 %49 }
 0x5a2   :  { %v79_v52 = vmul.f32 %v830_v11, %v50_v50 }
 0x5a4   :  { %v766_v46 = vpop.eup %765  ;;  %v87_v55 = vadd.f32 %v841_v19, %v79_v52 }
 0x5a5   :  { %457 = vrot.lane.b32.xlu0 %v766_v46, %s796_s25 }
 0x5a6   :  { %v158_v54 = vpop.permute.xlu1 %157 }
 0x5a7   :  { %v183_v57 = vmul.f32 %v843_v21, %v158_v54 }
 0x5a9   :  { %105 = vperm.xlu0 %716, %v23_v42  }
 0x5ab   :  { %v210_v59 = vpop.permute.xlu1 %209 }
 0x5ac   :  { %v235_v63 = vmul.f32 %v847_v27, %v210_v59 }
 0x5ad   :  { %719 = vset.pattern.permute.xlu0 %v791_v5 }
 0x5ae   :  { %261 = vperm.xlu0 %719, %v23_v42  }
 0x5b0   :  { %v314_v10 = vpop.permute.xlu1 %313 }
 0x5b1   :  { %v339_v14 = vmul.f32 %v855_v32, %v314_v10 }
 0x5b2   :  { %722 = vset.pattern.permute.xlu0 %v797_v62 }
 0x617   :  { %v458_v48 = vpop.permute.xlu0 %457 }
 0x618   :  { %v460_v49 = vmul.f32 %v458_v48, %v443_v38 }
 0x61a   :  { %469 = vperm.xlu0 %722, %v460_v49   ;;  %463 = vperm.xlu1 %721, %v460_v49  }
 0x61e   :  { %723 = vset.pattern.permute.xlu1 %v787_v0  ;;  %724 = vset.pattern.permute.xlu0 %v789_v3 }
 0x624   :  { %v106_v53 = vpop.permute.xlu0 %105 }
 0x625   :  { %v131_v56 = vmul.f32 %v836_v17, %v106_v53 }
 0x627   :  { %v139_v58 = vadd.f32 %v131_v56, %v87_v55 }
 0x629   :  { %v191_v61 = vadd.f32 %v183_v57, %v139_v58  ;;  %v262_v2 = vpop.permute.xlu0 %261 }
 0x62a   :  { %v287_v8 = vmul.f32 %v849_v28, %v262_v2 }
 0x62b   :  { %v243_v7 = vadd.f32 %v235_v63, %v191_v61 }
 0x62d   :  { %v295_v13 = vadd.f32 %v287_v8, %v243_v7 }
 0x62f   :  { %v347_v18 = vadd.f32 %v339_v14, %v295_v13 }
 0x695   :  { %v464_v15 = vpop.permute.xlu1 %463  ;;  %v470_v16 = vpop.permute.xlu0 %469 }
 0x696   :  { %v466_v20 = vmul.f32 %v464_v15, %v859_v36  ;;  %v472_v23 = vmul.f32 %v470_v16, %v863_v40 }
 0x698   :  { %v467_v22 = vadd.f32 %v466_v20, %v347_v18 }
 0x69a   :  { %v473_v24 = vadd.f32 %v472_v23, %v467_v22 }
 0x69c   :  { %v474_v25 = vmul.f32 %v871_v47, %v473_v24 }
 0x69e   :  { %767 = vtanh.f32 %v474_v25  ;;  %v25_v25 = vld [vmem:[%s1081_s0 + $0x28] sm:$0xff] }
 0x6ab   :  { %v768_v26 = vpop.eup %767 }
 0x6ac   :  { %v476_v29 = vmul.f32 %v768_v26, %v871_v47 }
 0x6ae   :  { %v477_v30 = vadd.f32 %v877_v51, %v476_v29 }
 0x6b0   :  { %480 = vrot.lane.b32.xlu1 %v477_v30, %s793_s21  ;;  %v478_v35 = vmul.f32 %v477_v30, %v454_v45 }
 0x722   :  { %v481_v31 = vpop.permute.xlu1 %480 }
 0x723   :  { %v483_v33 = vmul.f32 %v481_v31, %v477_v30 }
 0x725   :  { %485 = vrot.lane.b32.xlu1 %v483_v33, %s794_s22 }
 0x729   :  { %54 = vperm.xlu1 %723, %v24_v34  }
 0x72d   :  { %725 = vset.pattern.permute.xlu1 %v788_v1 }
 0x72e   :  { %161 = vperm.xlu1 %725, %v24_v34  }
 0x732   :  { %726 = vset.pattern.permute.xlu1 %v790_v4 }
 0x733   :  { %213 = vperm.xlu1 %726, %v24_v34  }
 0x737   :  { %728 = vset.pattern.permute.xlu1 %v792_v6 }
 0x738   :  { %317 = vperm.xlu1 %728, %v24_v34  }
 0x73c   :  { %729 = vset.pattern.permute.xlu1 %v795_v60 }
 0x797   :  { %v486_v37 = vpop.permute.xlu1 %485 }
 0x798   :  { %v488_v38 = vadd.f32 %v486_v37, %v478_v35 }
 0x79a   :  { %769 = vtanh.f32 %v488_v38 }
 0x7a4   :  { %v55_v43 = vpop.permute.xlu1 %54 }
 0x7a5   :  { %v80_v44 = vmul.f32 %v830_v11, %v55_v43 }
 0x7a7   :  { %v770_v39 = vpop.eup %769  ;;  %v88_v48 = vadd.f32 %v841_v19, %v80_v44 }
 0x7a8   :  { %491 = vrot.lane.b32.xlu0 %v770_v39, %s796_s25 }
 0x7a9   :  { %v162_v46 = vpop.permute.xlu1 %161 }
 0x7aa   :  { %v184_v50 = vmul.f32 %v843_v21, %v162_v46 }
 0x7ac   :  { %109 = vperm.xlu0 %724, %v24_v34  }
 0x7ae   :  { %v214_v53 = vpop.permute.xlu1 %213 }
 0x7af   :  { %v236_v55 = vmul.f32 %v847_v27, %v214_v53 }
 0x7b0   :  { %727 = vset.pattern.permute.xlu0 %v791_v5 }
 0x7b1   :  { %265 = vperm.xlu0 %727, %v24_v34  }
 0x7b3   :  { %v318_v59 = vpop.permute.xlu1 %317 }
 0x7b4   :  { %v340_v63 = vmul.f32 %v855_v32, %v318_v59 }
 0x7b5   :  { %730 = vset.pattern.permute.xlu0 %v797_v62 }
 0x81a   :  { %v492_v41 = vpop.permute.xlu0 %491 }
 0x81b   :  { %v494_v42 = vmul.f32 %v492_v41, %v477_v30 }
 0x81d   :  { %503 = vperm.xlu0 %730, %v494_v42   ;;  %497 = vperm.xlu1 %729, %v494_v42  }
 0x821   :  { %731 = vset.pattern.permute.xlu1 %v787_v0  ;;  %732 = vset.pattern.permute.xlu0 %v789_v3 }
 0x827   :  { %v110_v45 = vpop.permute.xlu0 %109 }
 0x828   :  { %v132_v49 = vmul.f32 %v836_v17, %v110_v45 }
 0x82a   :  { %v140_v52 = vadd.f32 %v132_v49, %v88_v48 }
 0x82c   :  { %v192_v54 = vadd.f32 %v184_v50, %v140_v52  ;;  %v266_v56 = vpop.permute.xlu0 %265 }
 0x82d   :  { %v288_v58 = vmul.f32 %v849_v28, %v266_v56 }
 0x82e   :  { %v244_v57 = vadd.f32 %v236_v55, %v192_v54 }
 0x830   :  { %v296_v61 = vadd.f32 %v288_v58, %v244_v57 }
 0x832   :  { %v348_v8 = vadd.f32 %v340_v63, %v296_v61 }
 0x898   :  { %v498_v2 = vpop.permute.xlu1 %497  ;;  %v504_v7 = vpop.permute.xlu0 %503 }
 0x899   :  { %v500_v10 = vmul.f32 %v498_v2, %v859_v36  ;;  %v506_v14 = vmul.f32 %v504_v7, %v863_v40 }
 0x89b   :  { %v501_v13 = vadd.f32 %v500_v10, %v348_v8 }
 0x89d   :  { %v507_v15 = vadd.f32 %v506_v14, %v501_v13 }
 0x89f   :  { %v508_v16 = vmul.f32 %v871_v47, %v507_v15 }
 0x8a1   :  { %771 = vtanh.f32 %v508_v16  ;;  %v26_v16 = vld [vmem:[%s1081_s0 + $0x30] sm:$0xff] }
 0x8ae   :  { %v772_v18 = vpop.eup %771 }
 0x8af   :  { %v510_v20 = vmul.f32 %v772_v18, %v871_v47 }
 0x8b1   :  { %v511_v22 = vadd.f32 %v877_v51, %v510_v20 }
 0x8b3   :  { %514 = vrot.lane.b32.xlu1 %v511_v22, %s793_s21  ;;  %v512_v26 = vmul.f32 %v511_v22, %v488_v38 }
 0x925   :  { %v515_v23 = vpop.permute.xlu1 %514 }
 0x926   :  { %v517_v24 = vmul.f32 %v515_v23, %v511_v22 }
 0x928   :  { %519 = vrot.lane.b32.xlu1 %v517_v24, %s794_s22 }
 0x92c   :  { %59 = vperm.xlu1 %731, %v25_v25  }
 0x930   :  { %733 = vset.pattern.permute.xlu1 %v788_v1 }
 0x931   :  { %165 = vperm.xlu1 %733, %v25_v25  }
 0x935   :  { %734 = vset.pattern.permute.xlu1 %v790_v4 }
 0x936   :  { %217 = vperm.xlu1 %734, %v25_v25  }
 0x93a   :  { %736 = vset.pattern.permute.xlu1 %v792_v6 }
 0x93b   :  { %321 = vperm.xlu1 %736, %v25_v25  }
 0x93f   :  { %737 = vset.pattern.permute.xlu1 %v795_v60 }
 0x99a   :  { %v520_v29 = vpop.permute.xlu1 %519 }
 0x99b   :  { %v522_v30 = vadd.f32 %v520_v29, %v512_v26 }
 0x99d   :  { %773 = vtanh.f32 %v522_v30 }
 0x9a7   :  { %v60_v35 = vpop.permute.xlu1 %59 }
 0x9a8   :  { %v81_v37 = vmul.f32 %v830_v11, %v60_v35 }
 0x9aa   :  { %v774_v31 = vpop.eup %773  ;;  %v89_v41 = vadd.f32 %v841_v19, %v81_v37 }
 0x9ab   :  { %525 = vrot.lane.b32.xlu0 %v774_v31, %s796_s25 }
 0x9ac   :  { %v166_v39 = vpop.permute.xlu1 %165 }
 0x9ad   :  { %v185_v43 = vmul.f32 %v843_v21, %v166_v39 }
 0x9af   :  { %113 = vperm.xlu0 %732, %v25_v25  }
 0x9b1   :  { %v218_v45 = vpop.permute.xlu1 %217 }
 0x9b2   :  { %v237_v48 = vmul.f32 %v847_v27, %v218_v45 }
 0x9b3   :  { %735 = vset.pattern.permute.xlu0 %v791_v5 }
 0x9b4   :  { %269 = vperm.xlu0 %735, %v25_v25  }
 0x9b6   :  { %v322_v53 = vpop.permute.xlu1 %321 }
 0x9b7   :  { %v341_v55 = vmul.f32 %v855_v32, %v322_v53 }
 0x9b8   :  { %738 = vset.pattern.permute.xlu0 %v797_v62 }
 0xa1d   :  { %v526_v33 = vpop.permute.xlu0 %525 }
 0xa1e   :  { %v528_v34 = vmul.f32 %v526_v33, %v511_v22 }
 0xa20   :  { %537 = vperm.xlu0 %738, %v528_v34   ;;  %531 = vperm.xlu1 %737, %v528_v34  }
 0xa24   :  { %739 = vset.pattern.permute.xlu1 %v787_v0  ;;  %740 = vset.pattern.permute.xlu0 %v789_v3 }
 0xa2a   :  { %v114_v38 = vpop.permute.xlu0 %113 }
 0xa2b   :  { %v133_v42 = vmul.f32 %v836_v17, %v114_v38 }
 0xa2d   :  { %v141_v44 = vadd.f32 %v133_v42, %v89_v41 }
 0xa2f   :  { %v193_v46 = vadd.f32 %v185_v43, %v141_v44  ;;  %v270_v49 = vpop.permute.xlu0 %269 }
 0xa30   :  { %v289_v52 = vmul.f32 %v849_v28, %v270_v49 }
 0xa31   :  { %v245_v50 = vadd.f32 %v237_v48, %v193_v46 }
 0xa33   :  { %v297_v54 = vadd.f32 %v289_v52, %v245_v50 }
 0xa35   :  { %v349_v58 = vadd.f32 %v341_v55, %v297_v54 }
 0xa9b   :  { %v532_v56 = vpop.permute.xlu1 %531  ;;  %v538_v57 = vpop.permute.xlu0 %537 }
 0xa9c   :  { %v534_v59 = vmul.f32 %v532_v56, %v859_v36  ;;  %v540_v63 = vmul.f32 %v538_v57, %v863_v40 }
 0xa9e   :  { %v535_v61 = vadd.f32 %v534_v59, %v349_v58 }
 0xaa0   :  { %v541_v2 = vadd.f32 %v540_v63, %v535_v61  ;;  %v27_v63 = vld [vmem:[%s1081_s0 + $0x38] sm:$0xff] }
 0xaa2   :  { %v542_v7 = vmul.f32 %v871_v47, %v541_v2 }
 0xaa4   :  { %775 = vtanh.f32 %v542_v7 }
 0xab1   :  { %v776_v8 = vpop.eup %775 }
 0xab2   :  { %v544_v10 = vmul.f32 %v776_v8, %v871_v47 }
 0xab4   :  { %v545_v13 = vadd.f32 %v877_v51, %v544_v10 }
 0xab6   :  { %548 = vrot.lane.b32.xlu1 %v545_v13, %s793_s21  ;;  %v546_v18 = vmul.f32 %v545_v13, %v522_v30 }
 0xb28   :  { %v549_v14 = vpop.permute.xlu1 %548 }
 0xb29   :  { %v551_v15 = vmul.f32 %v549_v14, %v545_v13 }
 0xb2b   :  { %553 = vrot.lane.b32.xlu1 %v551_v15, %s794_s22 }
 0xb2f   :  { %64 = vperm.xlu1 %739, %v26_v16  }
 0xb33   :  { %741 = vset.pattern.permute.xlu1 %v788_v1 }
 0xb34   :  { %169 = vperm.xlu1 %741, %v26_v16  }
 0xb38   :  { %742 = vset.pattern.permute.xlu1 %v790_v4 }
 0xb39   :  { %221 = vperm.xlu1 %742, %v26_v16  }
 0xb3d   :  { %744 = vset.pattern.permute.xlu1 %v792_v6 }
 0xb3e   :  { %325 = vperm.xlu1 %744, %v26_v16  }
 0xb42   :  { %745 = vset.pattern.permute.xlu1 %v795_v60 }
 0xb9d   :  { %v554_v20 = vpop.permute.xlu1 %553 }
 0xb9e   :  { %v556_v22 = vadd.f32 %v554_v20, %v546_v18 }
 0xba0   :  { %777 = vtanh.f32 %v556_v22 }
 0xbaa   :  { %v65_v26 = vpop.permute.xlu1 %64 }
 0xbab   :  { %v82_v29 = vmul.f32 %v830_v11, %v65_v26 }
 0xbad   :  { %v778_v23 = vpop.eup %777  ;;  %v90_v33 = vadd.f32 %v841_v19, %v82_v29 }
 0xbae   :  { %559 = vrot.lane.b32.xlu0 %v778_v23, %s796_s25 }
 0xbaf   :  { %v170_v31 = vpop.permute.xlu1 %169 }
 0xbb0   :  { %v186_v35 = vmul.f32 %v843_v21, %v170_v31 }
 0xbb2   :  { %117 = vperm.xlu0 %740, %v26_v16  }
 0xbb4   :  { %v222_v38 = vpop.permute.xlu1 %221 }
 0xbb5   :  { %v238_v41 = vmul.f32 %v847_v27, %v222_v38 }
 0xbb6   :  { %743 = vset.pattern.permute.xlu0 %v791_v5 }
 0xbb7   :  { %273 = vperm.xlu0 %743, %v26_v16  }
 0xbb9   :  { %v326_v43 = vpop.permute.xlu1 %325 }
 0xbba   :  { %v342_v45 = vmul.f32 %v855_v32, %v326_v43 }
 0xbbb   :  { %746 = vset.pattern.permute.xlu0 %v797_v62 }
 0xc20   :  { %v560_v24 = vpop.permute.xlu0 %559 }
 0xc21   :  { %v562_v25 = vmul.f32 %v560_v24, %v545_v13 }
 0xc23   :  { %571 = vperm.xlu0 %746, %v562_v25   ;;  %565 = vperm.xlu1 %745, %v562_v25  }
 0xc27   :  { %747 = vset.pattern.permute.xlu1 %v787_v0  ;;  %748 = vset.pattern.permute.xlu0 %v789_v3 }
 0xc2d   :  { %v118_v30 = vpop.permute.xlu0 %117 }
 0xc2e   :  { %v134_v34 = vmul.f32 %v836_v17, %v118_v30 }
 0xc30   :  { %v142_v37 = vadd.f32 %v134_v34, %v90_v33 }
 0xc32   :  { %v194_v39 = vadd.f32 %v186_v35, %v142_v37  ;;  %v274_v42 = vpop.permute.xlu0 %273 }
 0xc33   :  { %v290_v3 = vmul.f32 %v849_v28, %v274_v42 }
 0xc34   :  { %v246_v0 = vadd.f32 %v238_v41, %v194_v39 }
 0xc36   :  { %v298_v44 = vadd.f32 %v290_v3, %v246_v0 }
 0xc38   :  { %v350_v49 = vadd.f32 %v342_v45, %v298_v44  ;;  %v679_v45 = vld [vmem:[%s1082_s1 + $0xb] ss:$0 sm:$0xff] }
 0xc9e   :  { %v566_v46 = vpop.permute.xlu1 %565  ;;  %v572_v48 = vpop.permute.xlu0 %571 }
 0xc9f   :  { %v568_v50 = vmul.f32 %v566_v46, %v859_v36  ;;  %v574_v53 = vmul.f32 %v572_v48, %v863_v40 }
 0xca1   :  { %v569_v52 = vadd.f32 %v568_v50, %v350_v49 }
 0xca3   :  { %v575_v54 = vadd.f32 %v574_v53, %v569_v52  ;;  %v680_v53 = vld [vmem:[%s1082_s1 + $0xc] ss:$0 sm:$0xff] }
 0xca5   :  { %v576_v55 = vmul.f32 %v871_v47, %v575_v54 }
 0xca7   :  { %779 = vtanh.f32 %v576_v55 }
 0xcb4   :  { %v780_v56 = vpop.eup %779 }
 0xcb5   :  { %v578_v57 = vmul.f32 %v780_v56, %v871_v47 }
 0xcb7   :  { %v579_v58 = vadd.f32 %v877_v51, %v578_v57 }
 0xcb9   :  { %582 = vrot.lane.b32.xlu1 %v579_v58, %s793_s21  ;;  %v580_v2 = vmul.f32 %v579_v58, %v556_v22 }
 0xd2b   :  { %v583_v59 = vpop.permute.xlu1 %582 }
 0xd2c   :  { %v585_v61 = vmul.f32 %v583_v59, %v579_v58 }
 0xd2e   :  { %587 = vrot.lane.b32.xlu1 %v585_v61, %s794_s22 }
 0xd32   :  { %69 = vperm.xlu1 %747, %v27_v63  }
 0xd36   :  { %749 = vset.pattern.permute.xlu1 %v788_v1 }
 0xd37   :  { %173 = vperm.xlu1 %749, %v27_v63  }
 0xd3b   :  { %750 = vset.pattern.permute.xlu1 %v790_v4 }
 0xd3c   :  { %225 = vperm.xlu1 %750, %v27_v63  }
 0xd40   :  { %752 = vset.pattern.permute.xlu1 %v792_v6 }
 0xd41   :  { %329 = vperm.xlu1 %752, %v27_v63  }
 0xd45   :  { %753 = vset.pattern.permute.xlu1 %v795_v60 }
 0xda0   :  { %v588_v7 = vpop.permute.xlu1 %587 }
 0xda1   :  { %v590_v8 = vadd.f32 %v588_v7, %v580_v2 }
 0xda3   :  { %781 = vtanh.f32 %v590_v8 }
 0xdad   :  { %v70_v6 = vpop.permute.xlu1 %69 }
 0xdae   :  { %v83_v60 = vmul.f32 %v830_v11, %v70_v6 }
 0xdb0   :  { %v782_v10 = vpop.eup %781  ;;  %v91_v15 = vadd.f32 %v841_v19, %v83_v60 }
 0xdb1   :  { %593 = vrot.lane.b32.xlu0 %v782_v10, %s796_s25 }
 0xdb2   :  { %v174_v14 = vpop.permute.xlu1 %173 }
 0xdb3   :  { %v187_v18 = vmul.f32 %v843_v21, %v174_v14 }
 0xdb5   :  { %121 = vperm.xlu0 %748, %v27_v63  }
 0xdb9   :  { %751 = vset.pattern.permute.xlu0 %v791_v5  ;;  %v226_v5 = vpop.permute.xlu1 %225 }
 0xdba   :  { %277 = vperm.xlu0 %751, %v27_v63  }
 0xdbd   :  { %v330_v26 = vpop.permute.xlu1 %329 }
 0xdbe   :  { %754 = vset.pattern.permute.xlu0 %v797_v62  ;;  %v239_v62 = vmul.f32 %v847_v27, %v226_v5  ;;  %v343_v11 = vmul.f32 %v855_v32, %v330_v26 }
 0xe23   :  { %v594_v1 = vpop.permute.xlu0 %593 }
 0xe24   :  { %v596_v4 = vmul.f32 %v594_v1, %v579_v58 }
 0xe26   :  { %605 = vperm.xlu0 %754, %v596_v4   ;;  %599 = vperm.xlu1 %753, %v596_v4  }
 0xe30   :  { %v122_v13 = vpop.permute.xlu0 %121 }
 0xe31   :  { %v135_v16 = vmul.f32 %v836_v17, %v122_v13 }
 0xe33   :  { %v143_v20 = vadd.f32 %v135_v16, %v91_v15 }
 0xe35   :  { %v195_v22 = vadd.f32 %v187_v18, %v143_v20  ;;  %v278_v23 = vpop.permute.xlu0 %277 }
 0xe36   :  { %v291_v25 = vmul.f32 %v849_v28, %v278_v23 }
 0xe37   :  { %v247_v24 = vadd.f32 %v239_v62, %v195_v22 }
 0xe39   :  { %v299_v29 = vadd.f32 %v291_v25, %v247_v24 }
 0xe3b   :  { %v351_v19 = vadd.f32 %v343_v11, %v299_v29 }
 0xea1   :  { %v600_v30 = vpop.permute.xlu1 %599  ;;  %v606_v31 = vpop.permute.xlu0 %605 }
 0xea2   :  { %v602_v17 = vmul.f32 %v600_v30, %v859_v36  ;;  %v608_v21 = vmul.f32 %v606_v31, %v863_v40 }
 0xea4   :  { %v603_v33 = vadd.f32 %v602_v17, %v351_v19 }
 0xea6   :  { %v609_v34 = vadd.f32 %v608_v21, %v603_v33 }
 0xea8   :  { %v610_v35 = vmul.f32 %v871_v47, %v609_v34 }
 0xeaa   :  { %783 = vtanh.f32 %v610_v35 }
 0xeb7   :  { %v784_v27 = vpop.eup %783 }
 0xeb8   :  { %v612_v37 = vmul.f32 %v784_v27, %v871_v47  ;;  %v14_v47 = vld [vmem:[%s1082_s1 + $0x9] sm:$0x3] }
 0xeb9   :  { %v654_v43 = vrot.slane %v14_v47, %v832_v12 }
 0xeba   :  { %v613_v28 = vadd.f32 %v877_v51, %v612_v37  ;;  %v644_v51 = vrot.slane %v14_v47, %v824_v9  ;;  %v681_v9 = vld [vmem:[%s1082_s1 + $0xd] ss:$0 sm:$0xff] }
 0xebc   :  { %616 = vrot.lane.b32.xlu1 %v613_v28, %s793_s21  ;;  %v614_v39 = vmul.f32 %v613_v28, %v590_v8 }
 0xf2e   :  { %v617_v32 = vpop.permute.xlu1 %616 }
 0xf2f   :  { %v619_v38 = vmul.f32 %v617_v32, %v613_v28 }
 0xf31   :  { %621 = vrot.lane.b32.xlu1 %v619_v38, %s794_s22 }
 0xfa3   :  { %v622_v36 = vpop.permute.xlu1 %621 }
 0xfa4   :  { %v624_v41 = vadd.f32 %v622_v36, %v614_v39 }
 0xfa6   :  { %785 = vtanh.f32 %v624_v41 }
 0xfb3   :  { %v786_v40 = vpop.eup %785 }
 0xfb4   :  { %627 = vrot.lane.b32.xlu0 %v786_v40, %s796_s25 }
0x1026   :  { %v628_v42 = vpop.permute.xlu0 %627 }
0x1027   :  { %v630_v0 = vmul.f32 %v628_v42, %v613_v28 }
0x1029   :  { %v631_v3 = vmax.f32 %v630_v0, 0.0 }
0x102b   :  { %648 = vperm.xlu0 %754, %v631_v3   ;;  %638 = vperm.xlu1 %753, %v631_v3  }
0x10a6   :  { %v649_v44 = vpop.permute.xlu0 %648  ;;  %v639_v46 = vpop.permute.xlu1 %638 }
0x10a7   :  { %v645_v48 = vmul.f32 %v644_v51, %v639_v46  ;;  %v655_v49 = vmul.f32 %v654_v43, %v649_v44 }
0x10a9   :  { %v646_v50 = vadd.f32 %v679_v45, %v645_v48 }
0x10ab   :  { %v656_v52 = vadd.f32 %v655_v49, %v646_v50 }
0x10ad   :  { %v657_v54 = vmax.f32 %v656_v52, 0.0 }
0x10af   :  { %v662_v55 = vmul.f32 %v680_v53, %v657_v54 }
0x10b1   :  { %663 = vadd.xlane.f32.xlu1 %v662_v55 }
0x113a   :  { %v664_v12 = vpop.xlane.xlu1 %663 }
0x113b   :  { %v669_v56 = vadd.f32 %v681_v9, %v664_v12 }
0x113d   :  { %671 = vst.msk [vmem:[%s1083_s2] sm:$0xff] %vm670_vm0, %v669_v56 }

</bundles_post_ra>
